<compile_context>
chip_gen: v7x
topology: tpu7x:2x2x1
jax: 0.10.0
libtpu: 0.0.40
codegen_flags: <defaults>
</compile_context>

<pallas_src>
import functools

import jax
import jax.numpy as jnp
from jax.experimental import pallas as pl
from jax.experimental.pallas import tpu as pltpu


def _se_kernel(x_ref, w1t_ref, w2t_ref, o_ref, *, inv_l):
    # x_ref / o_ref: (bt, C, Lp)
    # w1t_ref:       (C, Cr)   first Linear weight, pre-transposed, f32
    # w2t_ref:       (Cr, C)   second Linear weight, pre-transposed, f32

    # Squeeze: adaptive avg-pool over L as an f32-accumulated lane reduce.
    # inv_l is 1/L_original so zero-padded lanes do not bias the mean.
    y = jnp.sum(x_ref[...], axis=-1, dtype=jnp.float32) * inv_l          # (bt, C)

    # Excitation: Linear -> ReLU -> Linear -> Sigmoid, all in f32 (tiny;
    # weights already f32, so no per-step casts).
    h = jnp.dot(y, w1t_ref[...], preferred_element_type=jnp.float32)     # (bt, Cr)
    h = jnp.maximum(h, 0.0)
    s = jnp.dot(h, w2t_ref[...], preferred_element_type=jnp.float32)     # (bt, C)
    s = jax.nn.sigmoid(s)

    # Scale: single elementwise pass over the tile in the native dtype
    # (per-channel scale broadcast along lanes is free).
    o_ref[...] = x_ref[...] * s.astype(o_ref.dtype)[:, :, None]


def _tpu_physical_vmem_bytes():
    """Per-TensorCore physical VMEM, generation-aware, conservative fallback."""
    try:
        vmem = int(pltpu.get_tpu_info().vmem_capacity_bytes)
        if vmem > 0:
            return vmem
    except Exception:
        pass
    try:
        kind = jax.devices()[0].device_kind.lower()
    except Exception:
        kind = ""
    if "v7" in kind:
        return 64 * 1024 * 1024          # v7x: 64 MiB per TC
    if "v5" in kind or "v6" in kind:
        return 128 * 1024 * 1024         # v5e / v6e: 128 MiB
    return 64 * 1024 * 1024              # unknown: be conservative


def se_layer(x, w1, w2, *, donate_x=False):
    """x: (B, C, L); w1: (C//r, C); w2: (C, C//r) — PyTorch Linear weight layout."""
    B, C, L = x.shape
    Cr = w1.shape[0]
    itemsize = jnp.dtype(x.dtype).itemsize

    # ---- Hoistable glue: pre-transpose + cast the (small) weights once. -----
    # Callers on a hot path should cache these f32 transposed copies.
    w1t = jnp.swapaxes(jnp.asarray(w1), 0, 1).astype(jnp.float32)   # (C, Cr)
    w2t = jnp.swapaxes(jnp.asarray(w2), 0, 1).astype(jnp.float32)   # (Cr, C)

    # ---- Lane-density guard: keep the output last dim a multiple of 128. ----
    # Zero padding along L is exact because the mean divides by the original L.
    Lp = L
    if L % 128 != 0:
        padded = pl.cdiv(L, 128) * 128
        # Only pad when the extra streamed traffic (<= 1.5x) is cheaper than
        # masked vst.msk partial stores on every output block.
        if padded <= (3 * L + 1) // 2:
            Lp = padded
    x_in = x if Lp == L else jnp.pad(x, ((0, 0), (0, 0), (0, Lp - L)))

    # ---- Generation-aware tiling policy. ------------------------------------
    physical_vmem = _tpu_physical_vmem_bytes()
    # ~75% of physical VMEM for the 4 double-buffered (in + out) x blocks:
    # ~96 MiB on v5e/v6e, ~48 MiB on v7x.
    x_block_budget = (physical_vmem * 3) // 4

    per_row_bytes = C * Lp * itemsize
    weights_bytes = 2 * C * Cr * 4      # both f32 weight tiles (resident)

    # 1) Hard cap: largest bt whose double-buffered in+out blocks fit the budget.
    bt_cap_vmem = max(1, x_block_budget // (4 * per_row_bytes))
    bt = min(B, bt_cap_vmem)

    # 2) Keep the grid deep enough for software pipelining and for
    #    dimension_semantics=("parallel",) to shard the batch axis across
    #    v7x's 2 TensorCores (>= ~4 steps when B allows, never grid=(1,)).
    min_steps = 4 if B >= 4 else (2 if B >= 2 else 1)
    bt = min(bt, max(1, B // min_steps))

    # 3) Per-step block-size floor (~1 MiB each direction) so the fixed
    #    ~0.35 us grid-step overhead stays hidden behind the DMA, especially
    #    at v7x's 3.2 TB/s HBM.  Never at the expense of the min-step depth
    #    or the VMEM cap.
    min_block_bytes = 1 * 1024 * 1024
    if bt * per_row_bytes < min_block_bytes:
        bt_floor = pl.cdiv(min_block_bytes, per_row_bytes)
        bt = max(bt, min(bt_floor, max(1, B // min_steps)))
    bt = max(1, min(bt, bt_cap_vmem, B))

    # Ragged grid: rows are independent, so a partial last block is safe
    # (out-of-range rows are never written back).
    grid = (pl.cdiv(B, bt),)

    # Explicit VMEM limit sized to the actual blocks (+ weights + slack) so
    # the 16 MiB (v5e) / 32 MiB (v6e, v7x) scoped defaults never cap the tile.
    vmem_needed = 4 * bt * per_row_bytes + 2 * weights_bytes + (2 << 20)
    vmem_limit_bytes = max(vmem_needed, 16 * 1024 * 1024)
    vmem_limit_bytes = min(vmem_limit_bytes, physical_vmem - (8 << 20))

    # Advisory cost estimate: this call is bandwidth-heavy, compute-trivial.
    cost = pl.CostEstimate(
        flops=2 * B * C * Lp + 4 * B * C * Cr,
        transcendentals=B * C,
        bytes_accessed=2 * B * C * Lp * itemsize + weights_bytes,
    )

    # TODO(synk): for shapes where a single (1, C, Lp) row exceeds the
    # per-generation VMEM budget (fires at ~half the row size on v7x vs v6e),
    # fall back to an L-tiled two-pass structure (pass 1: channel sums,
    # pass 2: scale) and accept the 1.5x HBM-traffic cost.

    kernel = functools.partial(_se_kernel, inv_l=float(1.0 / L))

    out = pl.pallas_call(
        kernel,
        out_shape=jax.ShapeDtypeStruct((B, C, Lp), x.dtype),
        grid_spec=pltpu.PrefetchScalarGridSpec(
            num_scalar_prefetch=0,
            grid=grid,
            in_specs=[
                pl.BlockSpec((bt, C, Lp), lambda i: (i, 0, 0)),  # streaming x tile
                pl.BlockSpec((C, Cr), lambda i: (0, 0)),         # full W1^T (resident)
                pl.BlockSpec((Cr, C), lambda i: (0, 0)),         # full W2^T (resident)
            ],
            out_specs=pl.BlockSpec((bt, C, Lp), lambda i: (i, 0, 0)),
        ),
        compiler_params=pltpu.CompilerParams(
            dimension_semantics=("parallel",),
            vmem_limit_bytes=int(vmem_limit_bytes),
        ),
        cost_estimate=cost,
        # Output aliases x (same shape/dtype) when the caller donates it:
        # halves HBM footprint around the custom call.
        input_output_aliases=({0: 0} if donate_x else {}),
    )(x_in, w1t, w2t)

    if Lp != L:
        out = out[..., :L]
    return out


def se_layer_ref(x, w1, w2):
    """Pure-JAX reference mirroring the PyTorch forward."""
    y = jnp.mean(x, axis=-1)                         # (B, C)
    h = jnp.maximum(y @ w1.T, 0.0)                   # (B, C//r)
    s = jax.nn.sigmoid(h @ w2.T)                     # (B, C)
    return x * s[:, :, None]


if __name__ == "__main__":
    # Small shapes consistent with the module; L = 128 keeps output stores
    # lane-dense and B = 8 gives a >= 4-step grid (pipelining + megacore).
    B, C, L = 8, 8, 128
    reduction = 4
    Cr = C // reduction

    key = jax.random.PRNGKey(0)
    kx, k1, k2 = jax.random.split(key, 3)

    x = jax.random.normal(kx, (B, C, L), dtype=jnp.float32)
    # Deterministic parameter init (PyTorch nn.Linear shapes: (out, in), bias=False).
    bound1 = 1.0 / (C ** 0.5)
    bound2 = 1.0 / (Cr ** 0.5)
    w1 = jax.random.uniform(k1, (Cr, C), minval=-bound1, maxval=bound1, dtype=jnp.float32)
    w2 = jax.random.uniform(k2, (C, Cr), minval=-bound2, maxval=bound2, dtype=jnp.float32)

    out = jax.block_until_ready(se_layer(x, w1, w2))

    ref = se_layer_ref(x, w1, w2)
    assert out.shape == (B, C, L)
    assert jnp.allclose(out, ref, atol=1e-5, rtol=1e-5), "mismatch vs reference"

    print("KERNEL_OK")
</pallas_src>

<mosaic_0001>
module attributes {stable_mosaic.version = 11 : i64} {
  func.func @_se_kernel(%arg0: i32, %arg1: memref<2x8x128xf32, #tpu.memory_space<vmem>>, %arg2: memref<8x2xf32, #tpu.memory_space<vmem>>, %arg3: memref<2x8xf32, #tpu.memory_space<vmem>>, %arg4: memref<2x8x128xf32, #tpu.memory_space<vmem>>) attributes {dimension_semantics = [#tpu.dimension_semantics<parallel>], iteration_bounds = array<i64: 4>, scalar_prefetch = 0 : i64, scratch_operands = 0 : i64, tpu.core_type = #tpu.core_type<tc>, window_params = [{transform_indices = @transform_0, window_bounds = array<i64: 2, 8, 128>}, {pipeline_mode = #tpu.pipeline_mode<synchronous>, transform_indices = @transform_1, window_bounds = array<i64: 8, 2>}, {pipeline_mode = #tpu.pipeline_mode<synchronous>, transform_indices = @transform_2, window_bounds = array<i64: 2, 8>}, {transform_indices = @transform_3, window_bounds = array<i64: 2, 8, 128>}]} {
    %c0 = arith.constant 0 : index
    %c0_0 = arith.constant 0 : index
    %c0_1 = arith.constant 0 : index
    %0 = vector.load %arg1[%c0, %c0_0, %c0_1] : memref<2x8x128xf32, #tpu.memory_space<vmem>>, vector<2x8x128xf32>
    %cst = arith.constant dense<0.000000e+00> : vector<2x8xf32>
    %1 = vector.multi_reduction <add>, %0, %cst [2] : vector<2x8x128xf32> to vector<2x8xf32>
    %cst_2 = arith.constant 7.812500e-03 : f32
    %2 = vector.broadcast %cst_2 : f32 to vector<2x8xf32>
    %3 = arith.mulf %1, %2 : vector<2x8xf32>
    %c0_3 = arith.constant 0 : index
    %c0_4 = arith.constant 0 : index
    %4 = vector.load %arg2[%c0_3, %c0_4] : memref<8x2xf32, #tpu.memory_space<vmem>>, vector<8x2xf32>
    %cst_5 = arith.constant dense<0.000000e+00> : vector<2x2xf32>
    %5 = tpu.matmul %3, %4, %cst_5 {dimension_numbers = #tpu.dot_dimension_numbers<[1], [0], [0], [1], [0, 0, 1, 1], [], []>} : vector<2x8xf32>, vector<8x2xf32>, vector<2x2xf32> -> vector<2x2xf32>
    %cst_6 = arith.constant 0.000000e+00 : f32
    %6 = vector.broadcast %cst_6 : f32 to vector<2x2xf32>
    %7 = arith.maximumf %5, %6 : vector<2x2xf32>
    %c0_7 = arith.constant 0 : index
    %c0_8 = arith.constant 0 : index
    %8 = vector.load %arg3[%c0_7, %c0_8] : memref<2x8xf32, #tpu.memory_space<vmem>>, vector<2x8xf32>
    %cst_9 = arith.constant dense<0.000000e+00> : vector<2x8xf32>
    %9 = tpu.matmul %7, %8, %cst_9 {dimension_numbers = #tpu.dot_dimension_numbers<[1], [0], [0], [1], [0, 0, 1, 1], [], []>} : vector<2x2xf32>, vector<2x8xf32>, vector<2x8xf32> -> vector<2x8xf32>
    %10 = arith.negf %9 : vector<2x8xf32>
    %11 = math.exp %10 : vector<2x8xf32>
    %cst_10 = arith.constant 1.000000e+00 : f32
    %12 = vector.broadcast %cst_10 : f32 to vector<2x8xf32>
    %13 = arith.addf %12, %11 : vector<2x8xf32>
    %14 = arith.divf %12, %13 : vector<2x8xf32>
    %c0_11 = arith.constant 0 : index
    %c0_12 = arith.constant 0 : index
    %c0_13 = arith.constant 0 : index
    %15 = vector.load %arg1[%c0_11, %c0_12, %c0_13] : memref<2x8x128xf32, #tpu.memory_space<vmem>>, vector<2x8x128xf32>
    %16 = vector.shape_cast %14 : vector<2x8xf32> to vector<2x8x1xf32>
    %17 = vector.broadcast %16 : vector<2x8x1xf32> to vector<2x8x128xf32>
    %18 = arith.mulf %15, %17 : vector<2x8x128xf32>
    %c0_14 = arith.constant 0 : index
    %c0_15 = arith.constant 0 : index
    %c0_16 = arith.constant 0 : index
    %19 = vector.load %arg4[%c0_14, %c0_15, %c0_16] : memref<2x8x128xf32, #tpu.memory_space<vmem>>, vector<2x8x128xf32>
    tpu.vector_store %arg4[%c0_14, %c0_15, %c0_16], %18 {strides = array<i32>} : memref<2x8x128xf32, #tpu.memory_space<vmem>>, vector<2x8x128xf32>,
    return
  }
  func.func @transform_0(%arg0: i32) -> (i32, i32, i32) {
    %c0_i32 = arith.constant 0 : i32
    %c0_i32_0 = arith.constant 0 : i32
    %c0_i32_1 = arith.constant 0 : i32
    return %arg0, %c0_i32, %c0_i32_0 : i32, i32, i32
  }
  func.func @transform_1(%arg0: i32) -> (i32, i32) {
    %c0_i32 = arith.constant 0 : i32
    %c0_i32_0 = arith.constant 0 : i32
    %c0_i32_1 = arith.constant 0 : i32
    return %c0_i32, %c0_i32_0 : i32, i32
  }
  func.func @transform_2(%arg0: i32) -> (i32, i32) {
    %c0_i32 = arith.constant 0 : i32
    %c0_i32_0 = arith.constant 0 : i32
    %c0_i32_1 = arith.constant 0 : i32
    return %c0_i32, %c0_i32_0 : i32, i32
  }
  func.func @transform_3(%arg0: i32) -> (i32, i32, i32) {
    %c0_i32 = arith.constant 0 : i32
    %c0_i32_0 = arith.constant 0 : i32
    %c0_i32_1 = arith.constant 0 : i32
    return %arg0, %c0_i32, %c0_i32_0 : i32, i32, i32
  }
}

</mosaic_0001>

<bundles_post_ra>
// kernel: tpu_custom_call.1
= control target key start
LH: loop header
LB: loop body
LE: loop exit
PB: predicated region body
PF: predicated region fallthrough
CT: control target
= control target key end

     0   :  { %8 = vsyncpa [#allocation3], 0  ;;  %s864_s0 = inlined_call_operand.hbm [shape: f32[8,8,128], index: 0, kind: input, shape index: {}]   ;;  %s865_s1 = inlined_call_operand.vmem [shape: f32[8,2], index: 1, kind: input, shape index: {}]   ;;  %s866_s2 = inlined_call_operand.vmem [shape: f32[2,8], index: 2, kind: input, shape index: {}]   ;;  %s867_s3 = inlined_call_operand.hbm [shape: f32[8,8,128], index: 3, kind: output, shape index: {}]  }
   0x1   :  { %10 = vsyncpa [#allocation3 + $0x1], 0 }
   0x2   :  { %11 = vsyncpa [#allocation4], 0 }
   0x3   :  { %13 = vsyncpa [#allocation4 + $0x1], 0  ;;  %s694_s12 = smov 0   ;;  %s696_s13 = smov 0  }
   0x4   :  { %s698_s14 = smov 0   ;;  %s700_s15 = smov 0  }
   0x5 LB: > { %s715_s16 = sadd.s32 4294967295, %s664_s15   ;;  %s478_s17 = sadd.s32 4294967294, %s664_s15   ;;  %s664_s15 = sphi %s700_s15, %s879_s15   ;;  %s660_s14 = sphi %s698_s14, %s878_s14   ;;  %s656_s13 = sphi %s696_s13, %s877_s13   ;;  %s652_s12 = sphi %s694_s12, %s876_s12  }
   0x6   : > { %s719_s18 = sadd.s32 1, %s664_s15   ;;  %s26_s19 = sadd.s32 1, %s660_s14 }
   0x7   : > { %s23_s20 = ssub.s32 %s664_s15, %s719_s18  ;;  %p33_p0 = scmp.ne.s32.totalorder %s660_s14, %s656_s13 }
   0x8   : > { %p24_p1 = scmp.eq.s32.totalorder %s23_s20, 0  ;;  %p34_p2 = scmp.eq.s32.totalorder %s664_s15, 0 }
   0x9   : > { %p39_p3 = scmp.ne.s32.totalorder %s656_s13, %s652_s12  ;;  %p40_p4 = scmp.eq.s32.totalorder %s715_s16, 0 }
   0xa   : > { %s731_s21 = scalar_select %p24_p1, %s660_s14, %s26_s19  }
   0xb   : > { %p733_p5 = por %p34_p2, %p33_p0  ;;  %p737_p6 = por %p40_p4, %p39_p3 }
   0xc   : > { %p105_p7 = scmp.eq.s32.totalorder %s715_s16, 3  ;;  %p111_p8 = scmp.eq.s32.totalorder %s478_s17, 3 }
   0xd   : > { %p524_p9 = scmp.lt.s32.totalorder %s664_s15, 4  ;;  %s137_s26 = sand.u32 1, %s660_s14  }
   0xe   : > { %p743_p10 = por %p105_p7, %p33_p0  ;;  %p747_p11 = por %p111_p8, %p39_p3 }
   0xf   : > { %s496_s27 = sshll.u32 %s664_s15, 8  ;;  %s481_s28 = sshll.u32 %s137_s26, 4 }
  0x10   : > { %s871_s24 = scalar_select %p743_p10, 1, 0 }
  0x11   : > { %s872_s25 = scalar_select %p747_p11, 1, 0 }
  0x12   : > { %s756_s4 = scalar_lea.hbm %s864_s0, %s496_s27  ;;  %s141_s5 = scalar_lea.vmem [#allocation2], %s481_s28 }
  0x13   : > { %s148_s6 = sshll.u32 %s141_s5, 4  ;;  %p760_p12 = pnand %p524_p9, %p733_p5  ;;  %s764_s6 = int_to_ptr.vmem [resolvable:$true] %s148_s6 }
  0x14   : > { %s766_s8 = scalar_lea.sflag [#allocation3], %s137_s26  ;;  %s568_s9 = scalar_lea.hbm %s756_s4, 256 }
  0x15   : > { %p569_p13 = scmp.ne.s32.totalorder %s756_s4, %s568_s9  ;;  %p570_p0 = pneg %p760_p12 }
  0x16   : > { %s573_s17 = scalar_lea.hbm %s864_s0, 1024  ;;  %p574_p3 = scmp.lt.u32.totalorder %s756_s4, %s864_s0 }
  0x17   : > { %p571_p1 = pnand %p570_p0, %p569_p13  ;;  %p575_p4 = scmp.lt.u32.totalorder %s573_s17, %s568_s9 }
  0x18   : > { %p577_p7 = scmp.lt.u32.totalorder %s568_s9, %s756_s4 }
  0x19   : > { %p572_p2 = pneg %p571_p1  ;;  %p576_p5 = por %p575_p4, %p574_p3 }
  0x1b   : > { %p578_p8 = por %p577_p7, %p576_p5 }
  0x1d   : > { %p579_p9 = pnand %p578_p8, %p572_p2 }
  0x1f   : > { %582 = shalt.err (!%p579_p9)
}
  0x20   : > { %s583_s22 = scalar_lea.vmem %s764_s6, 256  ;;  %s666_s26 = smov [#allocation2]  }
  0x21   : > { %p584_p13 = scmp.ne.s32.totalorder %s764_s6, %s583_s22  ;;  %s588_s27 = sshll.u32 %s666_s26, 4  ;;  %s589_s27 = int_to_ptr.vmem [resolvable:$false] %s588_s27 }
  0x22   : > { %s590_s28 = scalar_lea.vmem %s589_s27, 512  ;;  %p591_p10 = scmp.lt.s32.totalorder %s764_s6, %s589_s27 }
  0x23   : > { %p586_p1 = pnand %p584_p13, %p570_p0  ;;  %p592_p3 = scmp.lt.s32.totalorder %s590_s28, %s583_s22 }
  0x25   : > { %p587_p11 = pneg %p586_p1  ;;  %p593_p4 = por %p592_p3, %p591_p10 }
  0x27   : > { %p594_p5 = pnand %p593_p4, %p587_p11 }
  0x29   : > { %597 = shalt.err (!%p594_p5)
}
  0x2a   : > { %s667_s29 = smov 128   ;;  %s668_s30 = smov 8  }
  0x2b   : > { %519 = dma.hbm_to_vmem [thread:$0]  (!%p760_p12), %s756_s4, 256, %s764_s6, %s766_s8, %s667_s29, %s667_s29, %s668_s30  }
  0x2c   : > { %p484_p0 = scmp.ge.s32.totalorder %s664_s15, 1  ;;  %p156_p2 = scmp.lt.s32.totalorder %s664_s15, 5 }
  0x2e   : > { %p157_p7 = pnand %p484_p0, %p156_p2 }
  0x2f   : > { %s797_s5 = sand.u32 (!%p157_p7), 1, %s656_s13  }
  0x30   : > { %160 = sbr.rel (%p157_p7) target bundleno = 798 (0x31e), region = 32  ;;  %s485_s9 = sshll.u32 (!%p157_p7), %s797_s5, 4 }
  0x31   : > { %s163_s10 = scalar_lea.sflag (!%p157_p7), [#allocation3], %s797_s5  ;;  %s166_s11 = scalar_lea.vmem (!%p157_p7), [#allocation2], %s485_s9 }
  0x37   : > { %643 = dma.done.wait (%p737_p6), %s163_s10, 256  }
  0x38   : > { %645 = vsyncadd (%p737_p6), %s163_s10, 4294967040  ;;  %v191_v0 = vld [vmem:[%s166_s11] sm:$0xff]  ;;  %v192_v1 = vld [vmem:[%s166_s11 + $0x8] sm:$0xff]  ;;  %v669_v3 = vmov 0.0   ;;  %vm670_vm0 = vmmov 0   ;;  %v202_v4 = vlaneseq  ;;  %vm212_vm1 = vcmask 1041409  }
  0x39   : > { %193 = vadd.xlane.f32.xlu0 %v191_v0  ;;  %v199_v2 = vld [vmem:[%s865_s1] sm:$0xff]  ;;  %502 = vmatprep.subr.mxu0 %v669_v3  ;;  %vm214_vm2 = vcmask 64512   ;;  %vm293_vm3 = vcmask 1041408   ;;  %vm289_vm4 = vcmask 15360   ;;  %s188_s8 = scalar_lea.vmem [#allocation5], %s485_s9  ;;  %s497_s19 = sshll.u32 %s715_s16, 8 }
  0x3a   : > { %504 = vmatprep.mubr.msk.f32.mxu0 %vm670_vm0, %v669_v3  ;;  %503 = vmatpush3.msra.mxu0 %v199_v2  ;;  %v203_v5 = vand.u32 127, %v202_v4  ;;  %v205_v6 = vshrl.u32 %v202_v4, 7  ;;  %v288_v15 = vld [vmem:[%s866_s2] sm:$0x3]  ;;  %s405_s17 = sshll.u32 %s188_s8, 4  ;;  %s821_s26 = scalar_lea.hbm %s867_s3, %s497_s19  ;;  %s816_s17 = int_to_ptr.vmem [resolvable:$true] %s405_s17 }
  0x3b   : > { %507 = vmatprep.subr.mxu1 %v669_v3  ;;  %509 = vmatprep.mubr.msk.f32.mxu1 %vm670_vm0, %v669_v3  ;;  %s392_s27 = scalar_lea.sflag [#allocation4], %s797_s5  ;;  %s598_s28 = scalar_lea.vmem %s816_s17, 256 }
  0x3c   : > { %v206_v8 = vsub.s32 %v203_v5, %v205_v6  ;;  %508 = vmatpush3.msk.msra.mxu1 %vm293_vm3, %v288_v15  ;;  %v375_v24 = vsub.s32 0, %v205_v6  ;;  %v382_v27 = vsub.s32 1, %v205_v6  ;;  %p599_p6 = scmp.ne.s32.totalorder %s816_s17, %s598_s28  ;;  %p874_p10 = scmp.ne.s32.totalorder %s871_s24, 0 }
  0x3d   : > { %195 = vadd.xlane.f32.xlu0 %v192_v1  ;;  %s671_s16 = smov [#allocation5]  }
  0x3e   : > { %p600_p11 = pnand %p599_p6, %p874_p10  ;;  %s602_s29 = sshll.u32 %s671_s16, 4  ;;  %s603_s29 = int_to_ptr.vmem [resolvable:$false] %s602_s29 }
  0x3f   : > { %s604_s30 = scalar_lea.vmem %s603_s29, 512  ;;  %p605_p8 = scmp.lt.s32.totalorder %s816_s17, %s603_s29 }
  0x40   : > { %p601_p12 = pneg %p600_p11  ;;  %p606_p9 = scmp.lt.s32.totalorder %s604_s30, %s598_s28 }
  0x42   : > { %p607_p13 = por %p606_p9, %p605_p8 }
  0x44   : > { %p608_p1 = pnand %p607_p13, %p601_p12 }
  0xc6   : > { %v194_v7 = vpop.xlane.xlu0 %193 }
  0xc7   : > { %v197_v9 = vmul.f32 0.0078125, %v194_v7 }
  0xc9   : > { %v207_v12 = vrot.slane %v197_v9, %v206_v8 }
  0xca   : > { %v196_v10 = vpop.xlane.xlu0 %195 }
  0xcb   : > { %v198_v11 = vmul.f32 0.0078125, %v196_v10 }
  0xcd   : > { %v211_v13 = vrot.slane %v198_v11, %v206_v8 }
  0xcf   : > { %v213_v14 = vsel %vm212_vm1, %v211_v13, %v207_v12 }
  0xd0   : > { %505 = vmatmul.mubr.msk.f32.vlgmr.msra.gmra.mrb[0].mxu0 %vm214_vm2, %v213_v14 }
 0x1a3   : > { %v283_v16 = vpop.f32.mrb[0].mxu0 }
 0x1a4   : > { %v287_v17 = vmax.f32 %v283_v16, 0.0  ;;  %v506_v18 = vpop.f32.mrb[1].mxu0 }
 0x1a6   : > { %510 = vmatmul.mubr.msk.f32.vlgmr.msra.gmra.mrb[0].mxu1 %vm289_vm4, %v287_v17 }
 0x279   : > { %v363_v19 = vpop.f32.mrb[0].mxu1 }
 0x27a   : > { %v490_v20 = vmul.f32 -1.442695, %v363_v19  ;;  %v511_v21 = vpop.f32.mrb[1].mxu1 }
 0x27c   : > { %564 = vpow2.f32 %v490_v20 }
 0x286   : > { %v565_v22 = vpop.eup %564 }
 0x287   : > { %v370_v23 = vadd.f32 1.0, %v565_v22 }
 0x289   : > { %566 = vrcp.f32 %v370_v23 }
 0x293   : > { %v567_v25 = vpop.eup %566 }
 0x294   : > { %v376_v26 = vrot.slane %v567_v25, %v375_v24  ;;  %v383_v28 = vrot.slane %v567_v25, %v382_v27 }
 0x296   : > { %378 = vbcast.lane.b32.xlu1 %v376_v26, 256 }
 0x29a   : > { %385 = vbcast.lane.b32.xlu1 %v383_v28, 256 }
 0x308   : > { %v379_v29 = vpop.permute.xlu1 %378 }
 0x309   : > { %v387_v30 = vmul.f32 %v379_v29, %v191_v0 }
 0x30b   : > { %389 = vst [vmem:[%s188_s8] sm:$0xff] %v387_v30 }
 0x30c   : > { %v386_v31 = vpop.permute.xlu1 %385 }
 0x30d   : > { %v388_v32 = vmul.f32 %v386_v31, %v192_v1 }
 0x30f   : > { %390 = vst [vmem:[%s188_s8 + $0x8] sm:$0xff] %v388_v32 }
 0x310   : > { %611 = shalt.err (!%p608_p1)
}
 0x311   : > { %s612_s9 = scalar_lea.hbm %s821_s26, 256  ;;  %s616_s4 = scalar_lea.hbm %s867_s3, 1024 }
 0x312   : > { %p613_p3 = scmp.ne.s32.totalorder %s821_s26, %s612_s9  ;;  %p617_p0 = scmp.lt.u32.totalorder %s821_s26, %s867_s3 }
 0x313   : > { %p618_p2 = scmp.lt.u32.totalorder %s616_s4, %s612_s9  ;;  %p620_p6 = scmp.lt.u32.totalorder %s612_s9, %s821_s26 }
 0x314   : > { %p614_p4 = pnand %p613_p3, %p874_p10 }
 0x315   : > { %p619_p7 = por %p618_p2, %p617_p0 }
 0x316   : > { %p615_p5 = pneg %p614_p4 }
 0x317   : > { %p621_p11 = por %p620_p6, %p619_p7 }
 0x319   : > { %p622_p12 = pnand %p621_p11, %p615_p5 }
 0x31b   : > { %625 = shalt.err (!%p622_p12)
}
 0x31c   : > { %s672_s7 = smov 128   ;;  %s673_s8 = smov 8  }
 0x31d   : > { %514 = dma.vmem_to_hbm [thread:$0]  (%p874_p10), %s816_s17, 256, %s821_s26, %s392_s27, %s672_s7, %s672_s7, %s673_s8  }
 0x31e PF: > { %p525_p8 = scmp.ge.s32.totalorder %s664_s15, 2  ;;  %s420_s19 = sand.u32 1, %s652_s12  }
 0x31f   : > { %p875_p9 = scmp.ne.s32.totalorder %s872_s25, 0  ;;  %s421_s20 = scalar_lea.sflag [#allocation4], %s420_s19 }
 0x321   : > { %p521_p13 = pnand %p525_p8, %p875_p9 }
 0x323   : > { %647 = dma.done.wait (!%p521_p13), %s421_s20, 256  }
 0x324   : > { %649 = vsyncadd (!%p521_p13), %s421_s20, 4294967040  ;;  %p16_p1 = scmp.ge.s32.totalorder %s719_s18, 6   ;;  %s876_s12 = smov %s656_s13 }
 0x325   : > { %s877_s13 = smov %s660_s14  ;;  %s878_s14 = smov %s731_s21 }
 0x326   : > { %s879_s15 = smov %s719_s18  ;;  %18 = sbr.rel (!%p16_p1) target bundleno = 5 (0x5), region = 77 }
 0x32d   :  { %426 = vsyncpa [#allocation3], 1 }
 0x32e   :  { %428 = vsyncpa [#allocation3 + $0x1], 1 }
 0x32f   :  { %429 = vsyncpa [#allocation4], 1 }
 0x330   :  { %431 = vsyncpa [#allocation4 + $0x1], 1 }

</bundles_post_ra>
